<compile_context>
chip_gen: v6e
topology: v6e:2x2x1
jax: 0.10.0
libtpu: 0.0.40
codegen_flags: <defaults>
</compile_context>

<pallas_src>
import functools

import jax
import jax.numpy as jnp
from jax.experimental import pallas as pl
from jax.experimental.pallas import tpu as pltpu

BN_EPS = 1e-5


def _round_up(a: int, b: int) -> int:
    return (a + b - 1) // b * b


def value_head_kernel(x_ref, wp_ref, w1_ref, out_ref, *, G, L, r, H):
    # x_ref:   (TN, G, r*L)  input activations regrouped lane-dense (f32 or bf16)
    # wp_ref:  (G+4, LW)     packed params: rows [0,G) regrouped conv weight, row G conv+BN bias
    #                        (broadcast), row G+1 fc1 bias, row G+2 fc2 weight, row G+3 fc2 bias.
    # w1_ref:  (r*L, H)      fc1 weight (transposed, zero-padded rows beyond L), f32
    # out_ref: (1, TN)       tanh(value), batch on lanes
    Lr = r * L

    # 1x1 conv + folded BN: weighted sum over channel groups (VPU mul + sublane reduce), f32 accum.
    x = x_ref[...].astype(jnp.float32)                       # (TN, G, Lr)
    wg = wp_ref[0:G, 0:Lr]                                   # (G, Lr)
    s = jnp.sum(x * wg[None, :, :], axis=1)                  # (TN, Lr)

    # Fold the r interleaved channel halves back onto lanes [0, L) with XLU rolls (lanes [L, Lr)
    # hold don't-care values that are killed by the zero rows of w1_ref).
    folded = s
    for k in range(1, r):
        folded = folded + pltpu.roll(s, k * L, axis=1)

    v = jnp.maximum(folded + wp_ref[G:G + 1, 0:Lr], 0.0)     # + conv/BN bias, ReLU  (TN, Lr)

    # fc1: (TN, Lr) @ (Lr, H) on the MXU, f32 accumulation, + bias, ReLU.
    h = jnp.dot(v, w1_ref[...], preferred_element_type=jnp.float32)   # (TN, H)
    h = jnp.maximum(h + wp_ref[G + 1:G + 2, 0:H], 0.0)

    # fc2 transposed (w2 @ h^T) so the result is lane-dense (1, TN); + bias, tanh.
    w2 = wp_ref[G + 2:G + 3, 0:H]                            # (1, H)
    o = jax.lax.dot_general(w2, h, (((1,), (1,)), ((), ())),
                            preferred_element_type=jnp.float32)        # (1, TN)
    out_ref[...] = jnp.tanh(o + wp_ref[G + 3:G + 4, 0:1])


def value_head_forward(x_nchw, params, *, block_n=1024):
    """x_nchw: (N, C, H, W) float32/bfloat16 (no wrapper cast). Returns (N, 1) float32."""
    N, C, Hs, Ws = x_nchw.shape
    L = Hs * Ws
    Hd = params["w_fc1"].shape[1]

    # Lane-densify when possible: regroup r channels per row so the trailing dim is r*L (=128).
    r = 128 // L if (L < 128 and 128 % L == 0 and C % max(1, 128 // L) == 0) else 1
    G, Lr = C // r, r * L

    # Free metadata reshape of the contiguous C*H*W trailing block (no transpose, x read once).
    x_g = x_nchw.reshape(N, G, Lr)

    # Fold eval-mode BatchNorm2d(1) + conv bias into the conv weights (O(C) wrapper work).
    # TODO(synk): training-mode BN (batch statistics / running-stat updates) not implemented.
    gamma, beta, mean, var = params["bn"]
    inv = gamma / jnp.sqrt(var + BN_EPS)
    w_eff = params["w_conv"].astype(jnp.float32) * inv             # (C,)
    b_eff = (params["b_conv"] - mean) * inv + beta                  # scalar

    # Pack all tiny parameters into a single small f32 slab (one operand instead of five).
    LW = max(Lr, Hd)
    wg = jnp.repeat(w_eff.reshape(G, r), L, axis=1)                 # wg[g, m] = w_eff[g*r + m//L]
    wp = jnp.concatenate([
        jnp.pad(wg, ((0, 0), (0, LW - Lr))),
        jnp.full((1, LW), b_eff, jnp.float32),
        jnp.pad(params["b_fc1"].reshape(1, Hd).astype(jnp.float32), ((0, 0), (0, LW - Hd))),
        jnp.pad(params["w_fc2"].reshape(1, Hd).astype(jnp.float32), ((0, 0), (0, LW - Hd))),
        jnp.full((1, LW), params["b_fc2"], jnp.float32),
    ], axis=0).astype(jnp.float32)                                  # (G+4, LW)

    # fc1 weight, zero-row padded to the lane-dense K dim; kept f32 (accuracy is free here).
    w1p = params["w_fc1"].astype(jnp.float32)
    if Lr > L:
        w1p = jnp.pad(w1p, ((0, Lr - L), (0, 0)))                   # (Lr, Hd)

    # Batch tiling: one grid step covering the whole batch unless N exceeds block_n.  Multi-step
    # tiles are multiples of 128 so the lane-dense (1, TN) output block stays unmasked.
    if N <= block_n:
        TN = _round_up(N, 8)
    else:
        TN = _round_up(block_n, 128)
    Npad = _round_up(N, TN)
    if Npad != N:
        x_g = jnp.pad(x_g, ((0, Npad - N), (0, 0), (0, 0)))
    grid = (Npad // TN,)

    cost = pl.CostEstimate(
        flops=2 * Npad * (C * L + Lr * Hd + Hd),
        transcendentals=Npad,
        bytes_accessed=Npad * C * L * x_g.dtype.itemsize + wp.size * 4 + w1p.size * 4 + Npad * 4,
    )

    kernel = functools.partial(value_head_kernel, G=G, L=L, r=r, H=Hd)
    out = pl.pallas_call(
        kernel,
        out_shape=jax.ShapeDtypeStruct((1, Npad), jnp.float32),
        grid=grid,
        in_specs=[
            pl.BlockSpec((TN, G, Lr), lambda i: (i, 0, 0)),   # x: streamed per batch tile
            pl.BlockSpec((G + 4, LW), lambda i: (0, 0)),      # packed small params (resident)
            pl.BlockSpec((Lr, Hd), lambda i: (0, 0)),         # fc1 weight (resident)
        ],
        out_specs=pl.BlockSpec((1, TN), lambda i: (0, i)),    # lane-dense output, batch on lanes
        compiler_params=pltpu.CompilerParams(
            dimension_semantics=("parallel",),                # megacore-shards batch when grid >= 2
            vmem_limit_bytes=32 * 1024 * 1024,                # covers v5e's 16 MiB scoped default
        ),
        cost_estimate=cost,
    )(x_g, wp, w1p)
    return out[0, :N].reshape(N, 1)


def make_params(key, in_channels, board_len, hidden=128):
    L = board_len ** 2
    ks = jax.random.split(key, 6)
    return {
        # Conv2d(in_channels, 1, kernel_size=1): weight (1, C, 1, 1) stored as (C,)
        "w_conv": jax.random.normal(ks[0], (in_channels,), jnp.float32) * 0.1,
        "b_conv": jax.random.normal(ks[1], (), jnp.float32) * 0.1,
        # BatchNorm2d(1) eval stats: [gamma, beta, running_mean, running_var]
        "bn": jnp.array([1.2, 0.1, 0.05, 0.9], jnp.float32),
        # Linear(L, 128): PyTorch weight (128, L) stored transposed (L, 128)
        "w_fc1": jax.random.normal(ks[2], (L, hidden), jnp.float32) * 0.1,
        "b_fc1": jax.random.normal(ks[3], (1, hidden), jnp.float32) * 0.1,
        # Linear(128, 1): PyTorch weight (1, 128) stored as (1, 128)
        "w_fc2": jax.random.normal(ks[4], (1, hidden), jnp.float32) * 0.1,
        "b_fc2": jax.random.normal(ks[5], (), jnp.float32) * 0.1,
    }


def value_head_reference(x_nchw, params):
    """Pure-JAX f32 reference mirroring the PyTorch forward (eval-mode BN)."""
    N, C, H, W = x_nchw.shape
    x = x_nchw.reshape(N, C, H * W).astype(jnp.float32)
    gamma, beta, mean, var = params["bn"]
    conv = jnp.einsum("ncl,c->nl", x, params["w_conv"]) + params["b_conv"]
    y = (conv - mean) * (gamma / jnp.sqrt(var + BN_EPS)) + beta
    y = jnp.maximum(y, 0.0)
    h = jnp.maximum(y @ params["w_fc1"] + params["b_fc1"], 0.0)
    o = jnp.einsum("nh,oh->no", h, params["w_fc2"]) + params["b_fc2"]
    return jnp.tanh(o)


if __name__ == "__main__":
    # Small shapes consistent with ValueHead(in_channels, board_len); fc hidden = 128 per module.
    N, C, BOARD = 24, 32, 8          # x: (24, 32, 8, 8), L = 64 -> lane-densified to (24, 16, 128)
    key = jax.random.PRNGKey(0)
    kx, kp = jax.random.split(key)
    x = jax.random.normal(kx, (N, C, BOARD, BOARD), jnp.float32)
    params = make_params(kp, in_channels=C, board_len=BOARD)

    out = value_head_forward(x, params)          # default block_n -> single grid step
    out = jax.block_until_ready(out)

    ref = value_head_reference(x, params)
    assert out.shape == (N, 1)
    assert jnp.allclose(out, ref, atol=2e-2, rtol=2e-2), (
        float(jnp.max(jnp.abs(out - ref))), out[:4], ref[:4])
    print("KERNEL_OK")
</pallas_src>

<mosaic_0001>
module attributes {stable_mosaic.version = 11 : i64} {
  func.func @value_head_kernel(%arg0: i32, %arg1: memref<24x16x128xf32, #tpu.memory_space<vmem>>, %arg2: memref<20x128xf32, #tpu.memory_space<vmem>>, %arg3: memref<128x128xf32, #tpu.memory_space<vmem>>, %arg4: memref<1x24xf32, #tpu.memory_space<vmem>>) attributes {dimension_semantics = [#tpu.dimension_semantics<parallel>], iteration_bounds = array<i64: 1>, scalar_prefetch = 0 : i64, scratch_operands = 0 : i64, tpu.core_type = #tpu.core_type<tc>, window_params = [{transform_indices = @transform_0, window_bounds = array<i64: 24, 16, 128>}, {pipeline_mode = #tpu.pipeline_mode<synchronous>, transform_indices = @transform_1, window_bounds = array<i64: 20, 128>}, {pipeline_mode = #tpu.pipeline_mode<synchronous>, transform_indices = @transform_2, window_bounds = array<i64: 128, 128>}, {transform_indices = @transform_3, window_bounds = array<i64: 1, 24>}]} {
    %c0 = arith.constant 0 : index
    %c0_0 = arith.constant 0 : index
    %c0_1 = arith.constant 0 : index
    %0 = vector.load %arg1[%c0, %c0_0, %c0_1] : memref<24x16x128xf32, #tpu.memory_space<vmem>>, vector<24x16x128xf32>
    %c0_2 = arith.constant 0 : index
    %c0_3 = arith.constant 0 : index
    %1 = vector.load %arg2[%c0_2, %c0_3] : memref<20x128xf32, #tpu.memory_space<vmem>>, vector<16x128xf32>
    %2 = vector.shape_cast %1 : vector<16x128xf32> to vector<1x16x128xf32>
    %3 = vector.broadcast %2 : vector<1x16x128xf32> to vector<24x16x128xf32>
    %4 = arith.mulf %0, %3 : vector<24x16x128xf32>
    %cst = arith.constant dense<0.000000e+00> : vector<24x128xf32>
    %5 = vector.multi_reduction <add>, %4, %cst [1] : vector<24x16x128xf32> to vector<24x128xf32>
    %c64_i32 = arith.constant 64 : i32
    %6 = tpu.dynamic_rotate %5 by %c64_i32 dim 1 : vector<24x128xf32>, i32 -> vector<24x128xf32>
    %7 = arith.addf %5, %6 : vector<24x128xf32>
    %c16 = arith.constant 16 : index
    %c0_4 = arith.constant 0 : index
    %8 = vector.load %arg2[%c16, %c0_4] : memref<20x128xf32, #tpu.memory_space<vmem>>, vector<1x128xf32>
    %9 = vector.broadcast %8 : vector<1x128xf32> to vector<24x128xf32>
    %10 = arith.addf %7, %9 : vector<24x128xf32>
    %cst_5 = arith.constant 0.000000e+00 : f32
    %11 = vector.broadcast %cst_5 : f32 to vector<24x128xf32>
    %12 = arith.maximumf %10, %11 : vector<24x128xf32>
    %c0_6 = arith.constant 0 : index
    %c0_7 = arith.constant 0 : index
    %13 = vector.load %arg3[%c0_6, %c0_7] : memref<128x128xf32, #tpu.memory_space<vmem>>, vector<128x128xf32>
    %cst_8 = arith.constant dense<0.000000e+00> : vector<24x128xf32>
    %14 = tpu.matmul %12, %13, %cst_8 {dimension_numbers = #tpu.dot_dimension_numbers<[1], [0], [0], [1], [0, 0, 1, 1], [], []>} : vector<24x128xf32>, vector<128x128xf32>, vector<24x128xf32> -> vector<24x128xf32>
    %c17 = arith.constant 17 : index
    %c0_9 = arith.constant 0 : index
    %15 = vector.load %arg2[%c17, %c0_9] : memref<20x128xf32, #tpu.memory_space<vmem>>, vector<1x128xf32>
    %16 = vector.broadcast %15 : vector<1x128xf32> to vector<24x128xf32>
    %17 = arith.addf %14, %16 : vector<24x128xf32>
    %cst_10 = arith.constant 0.000000e+00 : f32
    %18 = vector.broadcast %cst_10 : f32 to vector<24x128xf32>
    %19 = arith.maximumf %17, %18 : vector<24x128xf32>
    %c18 = arith.constant 18 : index
    %c0_11 = arith.constant 0 : index
    %20 = vector.load %arg2[%c18, %c0_11] : memref<20x128xf32, #tpu.memory_space<vmem>>, vector<1x128xf32>
    %cst_12 = arith.constant dense<0.000000e+00> : vector<1x24xf32>
    %21 = tpu.matmul %20, %19, %cst_12 {dimension_numbers = #tpu.dot_dimension_numbers<[1], [1], [0], [0], [0, 0, 1, 0], [], []>} : vector<1x128xf32>, vector<24x128xf32>, vector<1x24xf32> -> vector<1x24xf32>
    %c19 = arith.constant 19 : index
    %c0_13 = arith.constant 0 : index
    %22 = vector.load %arg2[%c19, %c0_13] : memref<20x128xf32, #tpu.memory_space<vmem>>, vector<1x1xf32>
    %23 = vector.broadcast %22 : vector<1x1xf32> to vector<1x24xf32>
    %24 = arith.addf %21, %23 : vector<1x24xf32>
    %25 = math.tanh %24 : vector<1x24xf32>
    %c0_14 = arith.constant 0 : index
    %c0_15 = arith.constant 0 : index
    %26 = vector.load %arg4[%c0_14, %c0_15] : memref<1x24xf32, #tpu.memory_space<vmem>>, vector<1x24xf32>
    tpu.vector_store %arg4[%c0_14, %c0_15], %25 {strides = array<i32>} : memref<1x24xf32, #tpu.memory_space<vmem>>, vector<1x24xf32>,
    return
  }
  func.func @transform_0(%arg0: i32) -> (i32, i32, i32) {
    %c0_i32 = arith.constant 0 : i32
    %c0_i32_0 = arith.constant 0 : i32
    %c0_i32_1 = arith.constant 0 : i32
    return %arg0, %c0_i32, %c0_i32_0 : i32, i32, i32
  }
  func.func @transform_1(%arg0: i32) -> (i32, i32) {
    %c0_i32 = arith.constant 0 : i32
    %c0_i32_0 = arith.constant 0 : i32
    %c0_i32_1 = arith.constant 0 : i32
    return %c0_i32, %c0_i32_0 : i32, i32
  }
  func.func @transform_2(%arg0: i32) -> (i32, i32) {
    %c0_i32 = arith.constant 0 : i32
    %c0_i32_0 = arith.constant 0 : i32
    %c0_i32_1 = arith.constant 0 : i32
    return %c0_i32, %c0_i32_0 : i32, i32
  }
  func.func @transform_3(%arg0: i32) -> (i32, i32) {
    %c0_i32 = arith.constant 0 : i32
    %c0_i32_0 = arith.constant 0 : i32
    return %c0_i32, %arg0 : i32, i32
  }
}

</mosaic_0001>

<bundles_post_ra>
// kernel: tpu_custom_call.1
= control target key start
LH: loop header
LB: loop body
LE: loop exit
PB: predicated region body
PF: predicated region fallthrough
CT: control target
= control target key end

     0   :  { %8 = vsyncpa [#allocation3], 0  ;;  %s1240_s0 = inlined_call_operand.hbm [shape: f32[24,16,128], index: 0, kind: input, shape index: {}]   ;;  %s1241_s1 = inlined_call_operand.hbm [shape: f32[20,128], index: 1, kind: input, shape index: {}]   ;;  %s1242_s2 = inlined_call_operand.hbm [shape: f32[128,128], index: 2, kind: input, shape index: {}]   ;;  %s1243_s3 = inlined_call_operand.hbm [shape: f32[1,24], index: 3, kind: output, shape index: {}]  }
   0x1   :  { %9 = vsyncpa [#allocation6], 0 }
   0x2   :  { %10 = vsyncpa [#allocation4], 0  ;;  %s952_s12 = smov [#allocation5]   ;;  %s953_s14 = smov [#allocation2]  }
   0x3   :  { %s28_s13 = sshll.u32 %s952_s12, 4  ;;  %s16_s15 = sshll.u32 %s953_s14, 4  ;;  %s29_s13 = int_to_ptr.vmem [resolvable:$true] %s28_s13  ;;  %s17_s15 = int_to_ptr.vmem [resolvable:$true] %s16_s15 }
   0x4   :  { %s874_s16 = scalar_lea.vmem %s29_s13, 384  ;;  %p879_p1 = scmp.lt.s32.totalorder %s29_s13, %s29_s13 }
   0x5   :  { %p875_p0 = scmp.ne.s32.totalorder %s29_s13, %s874_s16  ;;  %p880_p2 = scmp.lt.s32.totalorder %s874_s16, %s874_s16 }
   0x7   :  { %p881_p3 = por %p880_p2, %p879_p1 }
   0x9   :  { %p882_p4 = pnand %p881_p3, %p875_p0 }
   0xb   :  { %885 = shalt.err (!%p882_p4)
}
   0xc   :  { %s954_s17 = smov 128   ;;  %s955_s18 = smov 8  }
   0xd   :  { %34 = dma.hbm_to_vmem [thread:$0]  %s1241_s1, 384, %s29_s13, [#allocation6], %s954_s17, %s954_s17, %s955_s18  }
   0xe   :  { %s894_s21 = scalar_lea.vmem %s17_s15, 6144  ;;  %p899_p6 = scmp.lt.s32.totalorder %s17_s15, %s17_s15 }
   0xf   :  { %p895_p5 = scmp.ne.s32.totalorder %s17_s15, %s894_s21  ;;  %p900_p7 = scmp.lt.s32.totalorder %s894_s21, %s894_s21 }
  0x11   :  { %p901_p8 = por %p900_p7, %p899_p6 }
  0x13   :  { %p902_p9 = pnand %p901_p8, %p895_p5 }
  0x15   :  { %905 = shalt.err (!%p902_p9)
}
  0x16   :  { %22 = dma.hbm_to_vmem [thread:$0]  %s1240_s0, 6144, %s17_s15, [#allocation3], %s954_s17, %s954_s17, %s955_s18  }
  0x17   :  { %s956_s24 = smov [#allocation7]  }
  0x18   :  { %s40_s25 = sshll.u32 %s956_s24, 4  ;;  %s41_s25 = int_to_ptr.vmem [resolvable:$true] %s40_s25 }
  0x19   :  { %s914_s26 = scalar_lea.vmem %s41_s25, 2048  ;;  %p919_p11 = scmp.lt.s32.totalorder %s41_s25, %s41_s25 }
  0x1a   :  { %p915_p10 = scmp.ne.s32.totalorder %s41_s25, %s914_s26  ;;  %p920_p12 = scmp.lt.s32.totalorder %s914_s26, %s914_s26 }
  0x1c   :  { %p921_p13 = por %p920_p12, %p919_p11 }
  0x1e   :  { %p922_p0 = pnand %p921_p13, %p915_p10 }
  0x20   :  { %925 = shalt.err (!%p922_p0)
}
  0x21   :  { %46 = dma.hbm_to_vmem [thread:$0]  %s1242_s2, 2048, %s41_s25, [#allocation6], %s954_s17, %s954_s17, %s955_s18  }
  0x22   :  { %946 = dma.done.wait [#allocation3], 6144  }
  0x23   :  { %947 = vsyncadd [#allocation3], 4294961152 }
  0x24   :  { %948 = dma.done.wait [#allocation6], 2432  }
  0x25   :  { %949 = vsyncadd [#allocation6], 4294964864  ;;  %v957_v0 = vmov 0.0   ;;  %v56_v1 = vld [vmem:[#allocation2] sm:$0xff]  ;;  %v57_v2 = vld [vmem:[#allocation2 + $0x8] sm:$0xff]  ;;  %vm346_vm0 = vcmask 1041409  }
  0x26   :  { %802 = vmatprep.subr.mxu0 %v957_v0  ;;  %843 = vmatprep.subr.mxu1 %v957_v0  ;;  %v58_v3 = vld [vmem:[#allocation2 + $0x10] sm:$0xff]  ;;  %v59_v4 = vld [vmem:[#allocation2 + $0x18] sm:$0xff]  ;;  %v60_v5 = vld [vmem:[#allocation2 + $0x20] sm:$0xff]  ;;  %vm348_vm1 = vcmask 1042434   ;;  %vm350_vm2 = vcmask 1043459   ;;  %vm352_vm3 = vcmask 1044484  }
  0x27   :  { %v61_v6 = vld [vmem:[#allocation2 + $0x28] sm:$0xff]  ;;  %v62_v7 = vld [vmem:[#allocation2 + $0x30] sm:$0xff]  ;;  %v63_v8 = vld [vmem:[#allocation2 + $0x38] sm:$0xff]  ;;  %vm354_vm4 = vcmask 1045509   ;;  %vm356_vm5 = vcmask 1046534   ;;  %vm358_vm6 = vcmask 1047559  }
  0x28   :  { %v64_v9 = vld [vmem:[#allocation2 + $0x40] sm:$0xff]  ;;  %v65_v10 = vld [vmem:[#allocation2 + $0x48] sm:$0xff]  ;;  %v66_v11 = vld [vmem:[#allocation2 + $0x50] sm:$0xff]  ;;  %s958_s0 = smov 64   ;;  %vm959_vm7 = vmmov 0   ;;  %s961_s2 = smov [#allocation8]  }
  0x29   :  { %v67_v12 = vld [vmem:[#allocation2 + $0x58] sm:$0xff]  ;;  %v68_v13 = vld [vmem:[#allocation2 + $0x60] sm:$0xff]  ;;  %v995_v15 = vld [vmem:[#allocation5 + $0x8] sm:$0xff]  ;;  %834 = vmatprep.mubr.msk.f32.mxu0 %vm959_vm7, %v957_v0  ;;  %849 = vmatprep.mubr.msk.f32.mxu1 %vm959_vm7, %v957_v0  ;;  %s767_s28 = sshll.u32 %s961_s2, 4  ;;  %vm759_vm8 = vcmask 188416   ;;  %s768_s28 = int_to_ptr.vmem [resolvable:$true] %s767_s28 }
  0x2a   :  { %v993_v14 = vld [vmem:[#allocation5] sm:$0xff]  ;;  %v69_v16 = vld [vmem:[#allocation2 + $0x68] sm:$0xff]  ;;  %v70_v17 = vld [vmem:[#allocation2 + $0x70] sm:$0xff]  ;;  %v107_v20 = vmul.f32 %v995_v15, %v57_v2  ;;  %v109_v22 = vmul.f32 %v995_v15, %v59_v4  ;;  %v111_v24 = vmul.f32 %v995_v15, %v61_v6  ;;  %v113_v26 = vmul.f32 %v995_v15, %v63_v8  ;;  %s926_s29 = scalar_lea.vmem %s768_s28, 16  ;;  %s930_s30 = scalar_lea.vmem %s768_s28, 32 }
  0x2b   :  { %v71_v18 = vld [vmem:[#allocation2 + $0x78] sm:$0xff]  ;;  %v106_v19 = vmul.f32 %v993_v14, %v56_v1  ;;  %v108_v21 = vmul.f32 %v993_v14, %v58_v3  ;;  %v110_v23 = vmul.f32 %v993_v14, %v60_v5  ;;  %v112_v25 = vmul.f32 %v993_v14, %v62_v7  ;;  %v523_v8 = vld [vmem:[#allocation7 + $0x78] sm:$0xff]  ;;  %p927_p1 = scmp.ne.s32.totalorder %s768_s28, %s926_s29  ;;  %p931_p2 = scmp.lt.s32.totalorder %s768_s28, %s768_s28 }
  0x2c   :  { %v114_v27 = vmul.f32 %v993_v14, %v64_v9  ;;  %v115_v28 = vmul.f32 %v995_v15, %v65_v10  ;;  %v116_v29 = vmul.f32 %v993_v14, %v66_v11  ;;  %v117_v30 = vmul.f32 %v995_v15, %v67_v12  ;;  %v522_v9 = vld [vmem:[#allocation7 + $0x70] sm:$0xff]  ;;  %803 = vmatpush3.msra.mxu0 %v523_v8  ;;  %p932_p3 = scmp.lt.s32.totalorder %s930_s30, %s926_s29 }
  0x2d   :  { %v118_v31 = vmul.f32 %v993_v14, %v68_v13  ;;  %v119_v32 = vmul.f32 %v995_v15, %v69_v16  ;;  %v120_v33 = vmul.f32 %v993_v14, %v70_v17  ;;  %v121_v34 = vmul.f32 %v995_v15, %v71_v18  ;;  %v88_v16 = vld [vmem:[#allocation2 + $0x100] sm:$0xff]  ;;  %v89_v17 = vld [vmem:[#allocation2 + $0x108] sm:$0xff]  ;;  %804 = vmatprep.subr.mxu0 %v957_v0 }
  0x2e   :  { %v154_v35 = vadd.f32 %v107_v20, %v106_v19  ;;  %v161_v36 = vadd.f32 %v109_v22, %v108_v21  ;;  %v168_v37 = vadd.f32 %v111_v24, %v110_v23  ;;  %v175_v38 = vadd.f32 %v113_v26, %v112_v25  ;;  %v90_v22 = vld [vmem:[#allocation2 + $0x110] sm:$0xff]  ;;  %v521_v23 = vld [vmem:[#allocation7 + $0x68] sm:$0xff]  ;;  %805 = vmatpush3.msra.mxu0 %v522_v9  ;;  %p933_p4 = por %p932_p3, %p931_p2 }
  0x2f   :  { %v182_v39 = vadd.f32 %v115_v28, %v114_v27  ;;  %v189_v40 = vadd.f32 %v117_v30, %v116_v29  ;;  %v196_v41 = vadd.f32 %v119_v32, %v118_v31  ;;  %v203_v42 = vadd.f32 %v121_v34, %v120_v33  ;;  %v91_v28 = vld [vmem:[#allocation2 + $0x118] sm:$0xff]  ;;  %v92_v29 = vld [vmem:[#allocation2 + $0x120] sm:$0xff]  ;;  %v93_v34 = vld [vmem:[#allocation2 + $0x128] sm:$0xff]  ;;  %806 = vmatprep.subr.mxu0 %v957_v0 }
  0x30   :  { %v155_v43 = vrot.slane %v154_v35, 4  ;;  %v162_v44 = vrot.slane %v161_v36, 4  ;;  %v169_v45 = vrot.slane %v168_v37, 4  ;;  %v176_v46 = vrot.slane %v175_v38, 4  ;;  %807 = vmatpush3.msra.mxu0 %v521_v23  ;;  %v517_v9 = vld [vmem:[#allocation7 + $0x48] sm:$0xff]  ;;  %p934_p5 = pnand %p933_p4, %p927_p1 }
  0x31   :  { %v183_v47 = vrot.slane %v182_v39, 4  ;;  %v190_v48 = vrot.slane %v189_v40, 4  ;;  %v197_v49 = vrot.slane %v196_v41, 4  ;;  %v204_v50 = vrot.slane %v203_v42, 4  ;;  %808 = vmatprep.subr.mxu0 %v957_v0 }
  0x32   :  { %v156_v51 = vadd.f32 %v155_v43, %v154_v35  ;;  %v163_v52 = vadd.f32 %v162_v44, %v161_v36  ;;  %v170_v53 = vadd.f32 %v169_v45, %v168_v37  ;;  %v177_v54 = vadd.f32 %v176_v46, %v175_v38  ;;  %v94_v35 = vld [vmem:[#allocation2 + $0x130] sm:$0xff]  ;;  %v520_v36 = vld [vmem:[#allocation7 + $0x60] sm:$0xff]  ;;  %v97_v43 = vld [vmem:[#allocation2 + $0x148] sm:$0xff] }
  0x33   :  { %v184_v55 = vadd.f32 %v183_v47, %v182_v39  ;;  %v191_v56 = vadd.f32 %v190_v48, %v189_v40  ;;  %v198_v57 = vadd.f32 %v197_v49, %v196_v41  ;;  %v205_v58 = vadd.f32 %v204_v50, %v203_v42  ;;  %v95_v41 = vld [vmem:[#allocation2 + $0x138] sm:$0xff]  ;;  %v96_v42 = vld [vmem:[#allocation2 + $0x140] sm:$0xff]  ;;  %v98_v45 = vld [vmem:[#allocation2 + $0x150] sm:$0xff]  ;;  %809 = vmatpush3.msra.mxu0 %v520_v36 }
  0x34   :  { %v157_v59 = vrot.slane %v156_v51, 2  ;;  %v164_v60 = vrot.slane %v163_v52, 2  ;;  %v171_v61 = vrot.slane %v170_v53, 2  ;;  %v178_v62 = vrot.slane %v177_v54, 2  ;;  %v99_v46 = vld [vmem:[#allocation2 + $0x158] sm:$0xff]  ;;  %v519_v50 = vld [vmem:[#allocation7 + $0x58] sm:$0xff]  ;;  %810 = vmatprep.subr.mxu0 %v957_v0 }
  0x35   :  { %v185_v63 = vrot.slane %v184_v55, 2  ;;  %v192_v1 = vrot.slane %v191_v56, 2  ;;  %v199_v2 = vrot.slane %v198_v57, 2  ;;  %v206_v3 = vrot.slane %v205_v58, 2  ;;  %811 = vmatpush3.msra.mxu0 %v519_v50 }
  0x36   :  { %v158_v4 = vadd.f32 %v157_v59, %v156_v51  ;;  %v165_v5 = vadd.f32 %v164_v60, %v163_v52  ;;  %v172_v6 = vadd.f32 %v171_v61, %v170_v53  ;;  %v179_v7 = vadd.f32 %v178_v62, %v177_v54  ;;  %v100_v52 = vld [vmem:[#allocation2 + $0x160] sm:$0xff]  ;;  %v101_v53 = vld [vmem:[#allocation2 + $0x168] sm:$0xff]  ;;  %v102_v54 = vld [vmem:[#allocation2 + $0x170] sm:$0xff]  ;;  %812 = vmatprep.subr.mxu0 %v957_v0 }
  0x37   :  { %v186_v10 = vadd.f32 %v185_v63, %v184_v55  ;;  %v193_v11 = vadd.f32 %v192_v1, %v191_v56  ;;  %v200_v12 = vadd.f32 %v199_v2, %v198_v57  ;;  %v207_v13 = vadd.f32 %v206_v3, %v205_v58  ;;  %v103_v59 = vld [vmem:[#allocation2 + $0x178] sm:$0xff]  ;;  %v518_v63 = vld [vmem:[#allocation7 + $0x50] sm:$0xff] }
  0x38   :  { %v159_v18 = vrot.slane %v158_v4, 1  ;;  %v166_v19 = vrot.slane %v165_v5, 1  ;;  %v173_v20 = vrot.slane %v172_v6, 1  ;;  %v180_v21 = vrot.slane %v179_v7, 1  ;;  %813 = vmatpush3.msra.mxu0 %v518_v63 }
  0x39   :  { %v187_v24 = vrot.slane %v186_v10, 1  ;;  %v194_v25 = vrot.slane %v193_v11, 1  ;;  %v201_v26 = vrot.slane %v200_v12, 1  ;;  %v208_v27 = vrot.slane %v207_v13, 1  ;;  %814 = vmatprep.subr.mxu0 %v957_v0 }
  0x3a   :  { %v1014_v30 = vadd.f32 %v159_v18, %v158_v4  ;;  %v1016_v31 = vadd.f32 %v166_v19, %v165_v5  ;;  %v1018_v32 = vadd.f32 %v173_v20, %v172_v6  ;;  %v1020_v33 = vadd.f32 %v180_v21, %v179_v7  ;;  %v516_v20 = vld [vmem:[#allocation7 + $0x40] sm:$0xff]  ;;  %815 = vmatpush3.msra.mxu0 %v517_v9 }
  0x3b   :  { %v1023_v37 = vadd.f32 %v187_v24, %v186_v10  ;;  %v1025_v38 = vadd.f32 %v194_v25, %v193_v11  ;;  %v1027_v39 = vadd.f32 %v201_v26, %v200_v12  ;;  %v1029_v40 = vadd.f32 %v208_v27, %v207_v13  ;;  %816 = vmatprep.subr.mxu0 %v957_v0 }
  0x3c   :  { %v347_v44 = vsel %vm346_vm0, %v1016_v31, %v1014_v30  ;;  %v138_v47 = vmul.f32 %v993_v14, %v88_v16  ;;  %v139_v48 = vmul.f32 %v995_v15, %v89_v17  ;;  %v140_v49 = vmul.f32 %v993_v14, %v90_v22  ;;  %817 = vmatpush3.msra.mxu0 %v516_v20  ;;  %v75_v20 = vld [vmem:[#allocation2 + $0x98] sm:$0xff] }
  0x3d   :  { %v349_v51 = vsel %vm348_vm1, %v1018_v32, %v347_v44  ;;  %v141_v55 = vmul.f32 %v995_v15, %v91_v28  ;;  %v142_v56 = vmul.f32 %v993_v14, %v92_v29  ;;  %v143_v57 = vmul.f32 %v995_v15, %v93_v34  ;;  %818 = vmatprep.subr.mxu0 %v957_v0 }
  0x3e   :  { %v351_v58 = vsel %vm350_vm2, %v1020_v33, %v349_v51  ;;  %v144_v60 = vmul.f32 %v993_v14, %v94_v35  ;;  %v145_v61 = vmul.f32 %v995_v15, %v95_v41  ;;  %v146_v62 = vmul.f32 %v993_v14, %v96_v42 }
  0x3f   :  { %v353_v1 = vsel %vm352_vm3, %v1023_v37, %v351_v58  ;;  %v147_v2 = vmul.f32 %v995_v15, %v97_v43  ;;  %v148_v3 = vmul.f32 %v993_v14, %v98_v45  ;;  %v149_v4 = vmul.f32 %v995_v15, %v99_v46 }
  0x40   :  { %v355_v5 = vsel %vm354_vm4, %v1025_v38, %v353_v1  ;;  %v150_v6 = vmul.f32 %v993_v14, %v100_v52  ;;  %v151_v7 = vmul.f32 %v995_v15, %v101_v53  ;;  %v152_v8 = vmul.f32 %v993_v14, %v102_v54 }
  0x41   :  { %v357_v10 = vsel %vm356_vm5, %v1027_v39, %v355_v5  ;;  %v153_v11 = vmul.f32 %v995_v15, %v103_v59  ;;  %v266_v12 = vadd.f32 %v139_v48, %v138_v47  ;;  %v273_v13 = vadd.f32 %v141_v55, %v140_v49 }
  0x42   :  { %v359_v16 = vsel %vm358_vm6, %v1029_v40, %v357_v10  ;;  %v280_v17 = vadd.f32 %v143_v57, %v142_v56  ;;  %v287_v18 = vadd.f32 %v145_v61, %v144_v60  ;;  %v294_v19 = vadd.f32 %v147_v2, %v146_v62  ;;  %v515_v2 = vld [vmem:[#allocation7 + $0x38] sm:$0xff] }
  0x43   :  { %377 = vrot.lane.b32.xlu0 %v359_v16, %s958_s0  ;;  %v267_v21 = vrot.slane %v266_v12, 4  ;;  %v274_v22 = vrot.slane %v273_v13, 4  ;;  %v301_v23 = vadd.f32 %v149_v4, %v148_v3  ;;  %v308_v24 = vadd.f32 %v151_v7, %v150_v6  ;;  %v72_v7 = vld [vmem:[#allocation2 + $0x80] sm:$0xff]  ;;  %819 = vmatpush3.msra.mxu0 %v515_v2 }
  0x44   :  { %v281_v25 = vrot.slane %v280_v17, 4  ;;  %v288_v26 = vrot.slane %v287_v18, 4  ;;  %v295_v27 = vrot.slane %v294_v19, 4  ;;  %v315_v28 = vadd.f32 %v153_v11, %v152_v8  ;;  %820 = vmatprep.subr.mxu0 %v957_v0 }
  0x45   :  { %v268_v29 = vadd.f32 %v267_v21, %v266_v12  ;;  %v275_v34 = vadd.f32 %v274_v22, %v273_v13  ;;  %v302_v35 = vrot.slane %v301_v23, 4  ;;  %v309_v36 = vrot.slane %v308_v24, 4  ;;  %v73_v12 = vld [vmem:[#allocation2 + $0x88] sm:$0xff]  ;;  %v74_v13 = vld [vmem:[#allocation2 + $0x90] sm:$0xff]  ;;  %v76_v21 = vld [vmem:[#allocation2 + $0xa0] sm:$0xff] }
  0x46   :  { %v282_v41 = vadd.f32 %v281_v25, %v280_v17  ;;  %v289_v42 = vadd.f32 %v288_v26, %v287_v18  ;;  %v296_v43 = vadd.f32 %v295_v27, %v294_v19  ;;  %v316_v44 = vrot.slane %v315_v28, 4  ;;  %v77_v22 = vld [vmem:[#allocation2 + $0xa8] sm:$0xff]  ;;  %v78_v26 = vld [vmem:[#allocation2 + $0xb0] sm:$0xff]  ;;  %v79_v27 = vld [vmem:[#allocation2 + $0xb8] sm:$0xff] }
  0x47   :  { %v269_v45 = vrot.slane %v268_v29, 2  ;;  %v276_v46 = vrot.slane %v275_v34, 2  ;;  %v303_v47 = vadd.f32 %v302_v35, %v301_v23  ;;  %v310_v48 = vadd.f32 %v309_v36, %v308_v24  ;;  %v81_v36 = vld [vmem:[#allocation2 + $0xc8] sm:$0xff] }
  0x48   :  { %v283_v49 = vrot.slane %v282_v41, 2  ;;  %v290_v50 = vrot.slane %v289_v42, 2  ;;  %v297_v51 = vrot.slane %v296_v43, 2  ;;  %v317_v52 = vadd.f32 %v316_v44, %v315_v28  ;;  %v80_v28 = vld [vmem:[#allocation2 + $0xc0] sm:$0xff] }
  0x49   :  { %v270_v53 = vadd.f32 %v269_v45, %v268_v29  ;;  %v277_v54 = vadd.f32 %v276_v46, %v275_v34  ;;  %v304_v55 = vrot.slane %v303_v47, 2  ;;  %v311_v56 = vrot.slane %v310_v48, 2  ;;  %v84_v46 = vld [vmem:[#allocation2 + $0xe0] sm:$0xff] }
  0x4a   :  { %v284_v57 = vadd.f32 %v283_v49, %v282_v41  ;;  %v291_v58 = vadd.f32 %v290_v50, %v289_v42  ;;  %v298_v59 = vadd.f32 %v297_v51, %v296_v43  ;;  %v318_v60 = vrot.slane %v317_v52, 2  ;;  %v82_v41 = vld [vmem:[#allocation2 + $0xd0] sm:$0xff]  ;;  %v83_v42 = vld [vmem:[#allocation2 + $0xd8] sm:$0xff] }
  0x4b   :  { %v271_v61 = vrot.slane %v270_v53, 1  ;;  %v278_v62 = vrot.slane %v277_v54, 1  ;;  %v305_v63 = vadd.f32 %v304_v55, %v303_v47  ;;  %v312_v1 = vadd.f32 %v311_v56, %v310_v48  ;;  %v85_v47 = vld [vmem:[#allocation2 + $0xe8] sm:$0xff]  ;;  %v86_v48 = vld [vmem:[#allocation2 + $0xf0] sm:$0xff] }
  0x4c   :  { %v285_v3 = vrot.slane %v284_v57, 1  ;;  %v292_v4 = vrot.slane %v291_v58, 1  ;;  %v299_v5 = vrot.slane %v298_v59, 1  ;;  %v319_v6 = vadd.f32 %v318_v60, %v317_v52 }
  0x4d   :  { %v1069_v8 = vadd.f32 %v271_v61, %v270_v53  ;;  %v1071_v9 = vadd.f32 %v278_v62, %v277_v54  ;;  %v306_v10 = vrot.slane %v305_v63, 1  ;;  %v313_v11 = vrot.slane %v312_v1, 1  ;;  %v87_v53 = vld [vmem:[#allocation2 + $0xf8] sm:$0xff] }
  0x4e   :  { %v1074_v16 = vadd.f32 %v285_v3, %v284_v57  ;;  %v1076_v17 = vadd.f32 %v292_v4, %v291_v58  ;;  %v1078_v18 = vadd.f32 %v299_v5, %v298_v59  ;;  %v320_v19 = vrot.slane %v319_v6, 1 }
  0x4f   :  { %v1080_v23 = vadd.f32 %v306_v10, %v305_v63  ;;  %v1082_v24 = vadd.f32 %v313_v11, %v312_v1  ;;  %v367_v25 = vsel %vm346_vm0, %v1071_v9, %v1069_v8  ;;  %v122_v29 = vmul.f32 %v993_v14, %v72_v7 }
  0x50   :  { %v1088_v34 = vadd.f32 %v320_v19, %v319_v6  ;;  %v368_v35 = vsel %vm348_vm1, %v1074_v16, %v367_v25  ;;  %v123_v43 = vmul.f32 %v995_v15, %v73_v12  ;;  %v124_v44 = vmul.f32 %v993_v14, %v74_v13 }
  0x51   :  { %v369_v45 = vsel %vm350_vm2, %v1076_v17, %v368_v35  ;;  %v125_v49 = vmul.f32 %v995_v15, %v75_v20  ;;  %v126_v50 = vmul.f32 %v993_v14, %v76_v21  ;;  %v127_v51 = vmul.f32 %v995_v15, %v77_v22 }
  0x52   :  { %v370_v52 = vsel %vm352_vm3, %v1078_v18, %v369_v45  ;;  %v128_v54 = vmul.f32 %v993_v14, %v78_v26  ;;  %v129_v55 = vmul.f32 %v995_v15, %v79_v27  ;;  %v130_v56 = vmul.f32 %v993_v14, %v80_v28 }
  0x53   :  { %v371_v57 = vsel %vm354_vm4, %v1080_v23, %v370_v52  ;;  %v131_v58 = vmul.f32 %v995_v15, %v81_v36  ;;  %v132_v59 = vmul.f32 %v993_v14, %v82_v41  ;;  %v133_v60 = vmul.f32 %v995_v15, %v83_v42 }
  0x54   :  { %v372_v61 = vsel %vm356_vm5, %v1082_v24, %v371_v57  ;;  %v134_v62 = vmul.f32 %v993_v14, %v84_v46  ;;  %v135_v63 = vmul.f32 %v995_v15, %v85_v47  ;;  %v136_v1 = vmul.f32 %v993_v14, %v86_v48 }
  0x55   :  { %v373_v2 = vsel %vm358_vm6, %v1088_v34, %v372_v61  ;;  %v137_v3 = vmul.f32 %v995_v15, %v87_v53  ;;  %v210_v4 = vadd.f32 %v123_v43, %v122_v29  ;;  %v217_v5 = vadd.f32 %v125_v49, %v124_v44 }
  0x56   :  { %381 = vrot.lane.b32.xlu1 %v373_v2, %s958_s0  ;;  %v224_v6 = vadd.f32 %v127_v51, %v126_v50  ;;  %v231_v7 = vadd.f32 %v129_v55, %v128_v54  ;;  %v238_v10 = vadd.f32 %v131_v58, %v130_v56  ;;  %v245_v11 = vadd.f32 %v133_v60, %v132_v59  ;;  %v514_v54 = vld [vmem:[#allocation7 + $0x30] sm:$0xff] }
  0x57   :  { %v211_v12 = vrot.slane %v210_v4, 4  ;;  %v218_v13 = vrot.slane %v217_v5, 4  ;;  %v252_v19 = vadd.f32 %v135_v63, %v134_v62  ;;  %v259_v20 = vadd.f32 %v137_v3, %v136_v1  ;;  %821 = vmatpush3.msra.mxu0 %v514_v54  ;;  %v513_v63 = vld [vmem:[#allocation7 + $0x28] sm:$0xff] }
  0x58   :  { %v225_v21 = vrot.slane %v224_v6, 4  ;;  %v232_v22 = vrot.slane %v231_v7, 4  ;;  %v239_v14 = vrot.slane %v238_v10, 4  ;;  %v246_v25 = vrot.slane %v245_v11, 4  ;;  %822 = vmatprep.subr.mxu0 %v957_v0 }
  0x59   :  { %v212_v26 = vadd.f32 %v211_v12, %v210_v4  ;;  %v219_v27 = vadd.f32 %v218_v13, %v217_v5  ;;  %v253_v28 = vrot.slane %v252_v19, 4  ;;  %v260_v15 = vrot.slane %v259_v20, 4  ;;  %823 = vmatpush3.msra.mxu0 %v513_v63 }
  0x5a   :  { %v226_v29 = vadd.f32 %v225_v21, %v224_v6  ;;  %v233_v35 = vadd.f32 %v232_v22, %v231_v7  ;;  %v240_v36 = vadd.f32 %v239_v14, %v238_v10  ;;  %v247_v41 = vadd.f32 %v246_v25, %v245_v11  ;;  %824 = vmatprep.subr.mxu0 %v957_v0  ;;  %v512_v11 = vld [vmem:[#allocation7 + $0x20] sm:$0xff]  ;;  %v511_v22 = vld [vmem:[#allocation7 + $0x18] sm:$0xff]  ;;  %v510_v14 = vld [vmem:[#allocation7 + $0x10] sm:$0xff] }
  0x5b   :  { %v213_v42 = vrot.slane %v212_v26, 2  ;;  %v220_v43 = vrot.slane %v219_v27, 2  ;;  %v254_v44 = vadd.f32 %v253_v28, %v252_v19  ;;  %v261_v45 = vadd.f32 %v260_v15, %v259_v20  ;;  %825 = vmatpush3.msra.mxu0 %v512_v11  ;;  %v509_v15 = vld [vmem:[#allocation7 + $0x8] sm:$0xff] }
  0x5c   :  { %v227_v46 = vrot.slane %v226_v29, 2  ;;  %v234_v47 = vrot.slane %v233_v35, 2  ;;  %v241_v48 = vrot.slane %v240_v36, 2  ;;  %v248_v49 = vrot.slane %v247_v41, 2  ;;  %826 = vmatprep.subr.mxu0 %v957_v0 }
  0x5d   :  { %v214_v50 = vadd.f32 %v213_v42, %v212_v26  ;;  %v221_v51 = vadd.f32 %v220_v43, %v219_v27  ;;  %v255_v52 = vrot.slane %v254_v44, 2  ;;  %v262_v53 = vrot.slane %v261_v45, 2  ;;  %827 = vmatpush3.msra.mxu0 %v511_v22 }
  0x5e   :  { %v228_v55 = vadd.f32 %v227_v46, %v226_v29  ;;  %v235_v56 = vadd.f32 %v234_v47, %v233_v35  ;;  %v242_v57 = vadd.f32 %v241_v48, %v240_v36  ;;  %v249_v58 = vadd.f32 %v248_v49, %v247_v41  ;;  %828 = vmatprep.subr.mxu0 %v957_v0  ;;  %v508_v36 = vld [vmem:[#allocation7] sm:$0xff]  ;;  %v1161_v48 = vld [vmem:[#allocation5 + $0x10] ss:$0 sm:$0xff] }
  0x5f   :  { %v215_v59 = vrot.slane %v214_v50, 1  ;;  %v222_v60 = vrot.slane %v221_v51, 1  ;;  %v256_v61 = vadd.f32 %v255_v52, %v254_v44  ;;  %v263_v62 = vadd.f32 %v262_v53, %v261_v45  ;;  %829 = vmatpush3.msra.mxu0 %v510_v14 }
  0x60   :  { %v229_v1 = vrot.slane %v228_v55, 1  ;;  %v236_v2 = vrot.slane %v235_v56, 1  ;;  %v243_v3 = vrot.slane %v242_v57, 1  ;;  %v250_v4 = vrot.slane %v249_v58, 1  ;;  %830 = vmatprep.subr.mxu0 %v957_v0 }
  0x61   :  { %v1119_v5 = vadd.f32 %v215_v59, %v214_v50  ;;  %v1121_v6 = vadd.f32 %v222_v60, %v221_v51  ;;  %v257_v7 = vrot.slane %v256_v61, 1  ;;  %v264_v10 = vrot.slane %v263_v62, 1  ;;  %831 = vmatpush3.msra.mxu0 %v509_v15 }
  0x62   :  { %v1124_v12 = vadd.f32 %v229_v1, %v228_v55  ;;  %v1126_v13 = vadd.f32 %v236_v2, %v235_v56  ;;  %v1128_v19 = vadd.f32 %v243_v3, %v242_v57  ;;  %v1130_v20 = vadd.f32 %v250_v4, %v249_v58  ;;  %832 = vmatprep.subr.mxu0 %v957_v0 }
  0x63   :  { %v360_v21 = vsel %vm346_vm0, %v1121_v6, %v1119_v5  ;;  %v1136_v25 = vadd.f32 %v257_v7, %v256_v61  ;;  %v1142_v27 = vadd.f32 %v264_v10, %v263_v62  ;;  %833 = vmatpush3.msra.mxu0 %v508_v36 }
  0x64   :  { %v361_v26 = vsel %vm348_vm1, %v1124_v12, %v360_v21 }
  0x65   :  { %v362_v28 = vsel %vm350_vm2, %v1126_v13, %v361_v26 }
  0x66   :  { %v363_v29 = vsel %vm352_vm3, %v1128_v19, %v362_v28 }
  0x67   :  { %v364_v35 = vsel %vm354_vm4, %v1130_v20, %v363_v29 }
  0x68   :  { %v365_v41 = vsel %vm356_vm5, %v1136_v25, %v364_v35 }
  0x69   :  { %v366_v42 = vsel %vm358_vm6, %v1142_v27, %v365_v41 }
  0x6a   :  { %379 = vrot.lane.b32.xlu0 %v366_v42, %s958_s0 }
  0xb5   :  { %v378_v43 = vpop.permute.xlu0 %377 }
  0xb6   :  { %v386_v44 = vrot.slane %v378_v43, 1  ;;  %v387_v45 = vrot.slane %v378_v43, 2  ;;  %v388_v46 = vrot.slane %v378_v43, 3  ;;  %v431_v47 = vadd.f32 %v378_v43, %v1014_v30 }
  0xb7   :  { %v389_v49 = vrot.slane %v378_v43, 4  ;;  %v390_v50 = vrot.slane %v378_v43, 5  ;;  %v391_v51 = vrot.slane %v378_v43, 6  ;;  %v392_v52 = vrot.slane %v378_v43, 7 }
  0xb8   :  { %v432_v53 = vadd.f32 %v386_v44, %v1016_v31  ;;  %v433_v54 = vadd.f32 %v387_v45, %v1018_v32  ;;  %v434_v55 = vadd.f32 %v388_v46, %v1020_v33  ;;  %v460_v59 = vadd.f32 %v1161_v48, %v431_v47 }
  0xb9   :  { %v435_v56 = vadd.f32 %v389_v49, %v1023_v37  ;;  %v436_v57 = vadd.f32 %v390_v50, %v1025_v38  ;;  %v437_v58 = vadd.f32 %v391_v51, %v1027_v39  ;;  %v438_v30 = vadd.f32 %v392_v52, %v1029_v40 }
  0xba   :  { %v461_v60 = vadd.f32 %v1161_v48, %v432_v53  ;;  %v462_v61 = vadd.f32 %v1161_v48, %v433_v54  ;;  %v463_v31 = vadd.f32 %v1161_v48, %v434_v55  ;;  %v484_v1 = vmax.f32 %v460_v59, 0.0 }
  0xbb   :  { %v464_v32 = vadd.f32 %v1161_v48, %v435_v56  ;;  %v465_v33 = vadd.f32 %v1161_v48, %v436_v57  ;;  %v466_v37 = vadd.f32 %v1161_v48, %v437_v58  ;;  %v467_v38 = vadd.f32 %v1161_v48, %v438_v30 }
  0xbc   :  { %v485_v62 = vmax.f32 %v461_v60, 0.0  ;;  %v486_v39 = vmax.f32 %v462_v61, 0.0  ;;  %v487_v63 = vmax.f32 %v463_v31, 0.0 }
  0xbd   :  { %v488_v40 = vmax.f32 %v464_v32, 0.0  ;;  %v489_v2 = vmax.f32 %v465_v33, 0.0  ;;  %v490_v7 = vmax.f32 %v466_v37, 0.0  ;;  %v491_v10 = vmax.f32 %v467_v38, 0.0 }
  0xbe   :  { %v553_v3 = vrot.slane %v485_v62, 7  ;;  %v555_v4 = vrot.slane %v486_v39, 6  ;;  %v557_v21 = vrot.slane %v487_v63, 5 }
  0xbf   :  { %v559_v14 = vrot.slane %v488_v40, 4  ;;  %v561_v28 = vrot.slane %v489_v2, 3  ;;  %v563_v29 = vrot.slane %v490_v7, 2  ;;  %v565_v36 = vrot.slane %v491_v10, 1 }
  0xc0   :  { %v554_v11 = vsel %vm346_vm0, %v553_v3, %v484_v1 }
  0xc1   :  { %v556_v22 = vsel %vm348_vm1, %v555_v4, %v554_v11 }
  0xc2   :  { %v558_v26 = vsel %vm350_vm2, %v557_v21, %v556_v22 }
  0xc3   :  { %v560_v15 = vsel %vm352_vm3, %v559_v14, %v558_v26 }
  0xc4   :  { %v562_v35 = vsel %vm354_vm4, %v561_v28, %v560_v15 }
  0xc5   :  { %v564_v41 = vsel %vm356_vm5, %v563_v29, %v562_v35 }
  0xc6   :  { %v566_v42 = vsel %vm358_vm6, %v565_v36, %v564_v41 }
  0xc7   :  { %835 = vmatmul.mubr.f32.vlgmr.msra.gmra.mxu0 %v566_v42 }
  0xc8   :  { %v382_v43 = vpop.permute.xlu1 %381  ;;  %837 = vmatprep.mubr.msk.f32.mxu0 %vm959_vm7, %v957_v0 }
  0xc9   :  { %v400_v44 = vrot.slane %v382_v43, 1  ;;  %v401_v45 = vrot.slane %v382_v43, 2  ;;  %v402_v47 = vrot.slane %v382_v43, 3  ;;  %v447_v50 = vadd.f32 %v382_v43, %v1069_v8 }
  0xca   :  { %v403_v52 = vrot.slane %v382_v43, 4  ;;  %v404_v57 = vrot.slane %v382_v43, 5  ;;  %v405_v60 = vrot.slane %v382_v43, 6  ;;  %v406_v8 = vrot.slane %v382_v43, 7 }
  0xcb   :  { %v448_v46 = vadd.f32 %v400_v44, %v1071_v9  ;;  %v449_v49 = vadd.f32 %v401_v45, %v1074_v16  ;;  %v450_v53 = vadd.f32 %v402_v47, %v1076_v17  ;;  %v476_v55 = vadd.f32 %v1161_v48, %v447_v50 }
  0xcc   :  { %v451_v58 = vadd.f32 %v403_v52, %v1078_v18  ;;  %v452_v61 = vadd.f32 %v404_v57, %v1080_v23  ;;  %v453_v37 = vadd.f32 %v405_v60, %v1082_v24  ;;  %v454_v38 = vadd.f32 %v406_v8, %v1088_v34 }
  0xcd   :  { %v477_v51 = vadd.f32 %v1161_v48, %v448_v46  ;;  %v478_v54 = vadd.f32 %v1161_v48, %v449_v49  ;;  %v479_v9 = vadd.f32 %v1161_v48, %v450_v53  ;;  %v500_v59 = vmax.f32 %v476_v55, 0.0 }
  0xce   :  { %v480_v31 = vadd.f32 %v1161_v48, %v451_v58  ;;  %v481_v62 = vadd.f32 %v1161_v48, %v452_v61  ;;  %v482_v35 = vadd.f32 %v1161_v48, %v453_v37  ;;  %v483_v43 = vadd.f32 %v1161_v48, %v454_v38 }
  0xcf   :  { %v501_v56 = vmax.f32 %v477_v51, 0.0  ;;  %v502_v30 = vmax.f32 %v478_v54, 0.0  ;;  %v503_v17 = vmax.f32 %v479_v9, 0.0 }
  0xd0   :  { %v504_v39 = vmax.f32 %v480_v31, 0.0  ;;  %v505_v36 = vmax.f32 %v481_v62, 0.0  ;;  %v506_v52 = vmax.f32 %v482_v35, 0.0  ;;  %v682_v62 = vld [vmem:[#allocation5 + $0x13] sm:$0x1] }
  0xd1   :  { %v581_v16 = vrot.slane %v501_v56, 7  ;;  %v583_v32 = vrot.slane %v502_v30, 6  ;;  %v585_v40 = vrot.slane %v503_v17, 5 }
  0xd2   :  { %v587_v45 = vrot.slane %v504_v39, 4  ;;  %v589_v56 = vrot.slane %v505_v36, 3  ;;  %v591_v8 = vrot.slane %v506_v52, 2  ;;  %v960_v39 = vmov 0  }
  0xd3   :  { %v582_v33 = vsel %vm346_vm0, %v581_v16, %v500_v59  ;;  %v507_v59 = vmax.f32 %v483_v43, 0.0  ;;  %862 = vset.pattern.permute.xlu1 %v960_v39  ;;  %863 = vset.pattern.permute.xlu0 %v960_v39 }
  0xd4   :  { %v584_v63 = vsel %vm348_vm1, %v583_v32, %v582_v33  ;;  %685 = vperm.xlu1 %862, %v682_v62  }
  0xd5   :  { %v586_v44 = vsel %vm350_vm2, %v585_v40, %v584_v63  ;;  %v593_v37 = vrot.slane %v507_v59, 1 }
  0xd6   :  { %v588_v9 = vsel %vm352_vm3, %v587_v45, %v586_v44 }
  0xd7   :  { %v590_v17 = vsel %vm354_vm4, %v589_v56, %v588_v9 }
  0xd8   :  { %v592_v38 = vsel %vm356_vm5, %v591_v8, %v590_v17 }
  0xdc   :  { %v380_v18 = vpop.permute.xlu0 %379 }
  0xdd   :  { %v393_v1 = vrot.slane %v380_v18, 1  ;;  %v394_v2 = vrot.slane %v380_v18, 2  ;;  %v395_v23 = vrot.slane %v380_v18, 3  ;;  %v396_v3 = vrot.slane %v380_v18, 4 }
  0xde   :  { %v397_v4 = vrot.slane %v380_v18, 5  ;;  %v439_v7 = vadd.f32 %v380_v18, %v1119_v5  ;;  %v398_v10 = vrot.slane %v380_v18, 6  ;;  %v399_v11 = vrot.slane %v380_v18, 7 }
  0xdf   :  { %v440_v24 = vadd.f32 %v393_v1, %v1121_v6  ;;  %v441_v34 = vadd.f32 %v394_v2, %v1124_v12  ;;  %v442_v21 = vadd.f32 %v395_v23, %v1126_v13  ;;  %v443_v22 = vadd.f32 %v396_v3, %v1128_v19  ;;  %v778_v23 = vld [vmem:[#allocation5 + $0x11] ss:$0 sm:$0xff] }
  0xe0   :  { %v468_v14 = vadd.f32 %v1161_v48, %v439_v7  ;;  %v444_v26 = vadd.f32 %v397_v4, %v1130_v20  ;;  %v445_v28 = vadd.f32 %v398_v10, %v1136_v25  ;;  %v446_v15 = vadd.f32 %v399_v11, %v1142_v27 }
  0xe1   :  { %v469_v5 = vadd.f32 %v1161_v48, %v440_v24  ;;  %v470_v29 = vadd.f32 %v1161_v48, %v441_v34  ;;  %v471_v6 = vadd.f32 %v1161_v48, %v442_v21  ;;  %v472_v12 = vadd.f32 %v1161_v48, %v443_v22  ;;  %v681_v22 = vld [vmem:[#allocation5 + $0x12] sm:$0x1] }
  0xe2   :  { %v473_v13 = vadd.f32 %v1161_v48, %v444_v26  ;;  %v474_v19 = vadd.f32 %v1161_v48, %v445_v28  ;;  %v475_v25 = vadd.f32 %v1161_v48, %v446_v15  ;;  %v492_v46 = vmax.f32 %v468_v14, 0.0 }
  0xe3   :  { %v493_v20 = vmax.f32 %v469_v5, 0.0  ;;  %v494_v41 = vmax.f32 %v470_v29, 0.0  ;;  %v495_v27 = vmax.f32 %v471_v6, 0.0  ;;  %v496_v42 = vmax.f32 %v472_v12, 0.0 }
  0xe4   :  { %v497_v47 = vmax.f32 %v473_v13, 0.0  ;;  %v498_v51 = vmax.f32 %v474_v19, 0.0  ;;  %v499_v53 = vmax.f32 %v475_v25, 0.0  ;;  %v594_v18 = vsel %vm358_vm6, %v593_v37, %v592_v38 }
  0xe5   :  { %v567_v49 = vrot.slane %v493_v20, 7  ;;  %v569_v50 = vrot.slane %v494_v41, 6  ;;  %v571_v55 = vrot.slane %v495_v27, 5  ;;  %v573_v58 = vrot.slane %v496_v42, 4 }
  0xe6   :  { %v575_v30 = vrot.slane %v497_v47, 3  ;;  %v577_v60 = vrot.slane %v498_v51, 2  ;;  %v579_v31 = vrot.slane %v499_v53, 1 }
  0xe7   :  { %v568_v54 = vsel %vm346_vm0, %v567_v49, %v492_v46 }
  0xe8   :  { %v570_v57 = vsel %vm348_vm1, %v569_v50, %v568_v54 }
  0xe9   :  { %v572_v48 = vsel %vm350_vm2, %v571_v55, %v570_v57 }
  0xea   :  { %v574_v16 = vsel %vm352_vm3, %v573_v58, %v572_v48 }
  0xeb   :  { %v576_v61 = vsel %vm354_vm4, %v575_v30, %v574_v16 }
  0xec   :  { %v578_v32 = vsel %vm356_vm5, %v577_v60, %v576_v61 }
  0xed   :  { %v580_v33 = vsel %vm358_vm6, %v579_v31, %v578_v32 }
  0xee   :  { %838 = vmatmul.mubr.f32.gmra.mxu0 %v580_v33 }
  0xef   :  { %840 = vmatprep.mubr.msk.f32.mxu0 %vm959_vm7, %v957_v0 }
  0xf2   :  { %841 = vmatmul.mubr.f32.gmra.mxu0 %v594_v18 }
 0x14f   :  { %v686_v14 = vpop.permute.xlu1 %685 }
 0x187   :  { %v664_v63 = vpop.f32.mrf.mxu0 }
 0x188   :  { %v665_v24 = vadd.f32 %v778_v23, %v664_v63 }
 0x189   :  { %v836_v40 = vpop.f32.mrf.mxu0 }
 0x18a   :  { %v678_v21 = vmax.f32 %v665_v24, 0.0 }
 0x1ae   :  { %v669_v1 = vpop.f32.mrf.mxu0 }
 0x1af   :  { %v670_v10 = vadd.f32 %v778_v23, %v669_v1 }
 0x1b0   :  { %v839_v2 = vpop.f32.mrf.mxu0 }
 0x1b1   :  { %v679_v34 = vmax.f32 %v670_v10, 0.0 }
 0x1b2   :  { %v674_v3 = vpop.f32.mrf.mxu0 }
 0x1b3   :  { %v675_v4 = vadd.f32 %v778_v23, %v674_v3 }
 0x1b4   :  { %v842_v7 = vpop.f32.mrf.mxu0 }
 0x1b5   :  { %v680_v11 = vmax.f32 %v675_v4, 0.0 }
 0x1b7   :  { %844 = vmatpush3.xpose.msra.mxu1 %v680_v11 }
 0x1b8   :  { %845 = vmatprep.subr.mxu1 %v957_v0 }
 0x1bb   :  { %846 = vmatpush3.xpose.msra.mxu1 %v679_v34 }
 0x1bc   :  { %847 = vmatprep.subr.mxu1 %v957_v0 }
 0x1bf   :  { %848 = vmatpush3.xpose.msra.mxu1 %v678_v21 }
 0x1c2   :  { %850 = vmatmul.mubr.f32.vlgmr.msra.gmra.mxu1 %v681_v22 }
 0x282   :  { %v754_v26 = vpop.f32.mrf.mxu1 }
 0x283   :  { %v755_v28 = vadd.f32 %v754_v26, %v686_v14 }
 0x284   :  { %v851_v15 = vpop.f32.mrf.mxu1 }
 0x285   :  { %864 = vtanh.f32 %v755_v28 }
 0x292   :  { %v865_v5 = vpop.eup %864 }
 0x293   :  { %760 = vst.msk [vmem:[#allocation8] sm:$0x1] %vm759_vm8, %v865_v5 }
 0x294   :  { %937 = shalt.err (!%p934_p5)
}
 0x295   :  { %770 = dma.vmem_to_hbm [thread:$0]  %s768_s28, 16, %s1243_s3, [#allocation4]  }
 0x296   :  { %950 = dma.done.wait [#allocation4], 16  }
 0x297   :  { %951 = vsyncadd [#allocation4], 4294967280 }
 0x298   :  { %774 = vsyncpa [#allocation3], 1 }
 0x299   :  { %775 = vsyncpa [#allocation6], 1 }
 0x29a   :  { %776 = vsyncpa [#allocation4], 1 }

</bundles_post_ra>
